<compile_context>
chip_gen: v6e
topology: v6e:2x2x1
jax: 0.10.0
libtpu: 0.0.40
codegen_flags: <defaults>
</compile_context>

<pallas_src>
import functools

import jax
import jax.numpy as jnp
from jax.experimental import pallas as pl
from jax.experimental.pallas import tpu as pltpu


def _round_up(v, m):
    return ((v + m - 1) // m) * m


@functools.lru_cache(maxsize=None)
def _vmem_capacity_bytes():
    """Physical VMEM per TensorCore (generation-aware budget), with fallback."""
    try:
        return int(pltpu.get_tpu_info().vmem_capacity_bytes)
    except Exception:
        return 64 << 20  # conservative fallback: v7x physical VMEM per TC


def prepare_weights(wv, wu, w1, gate=True, dtype=None):
    """One-time weight preparation (hoisted out of the per-call path).

    wv, wu: (L, length); w1: (1, L).
    Returns (wcat_t, w1_row):
      wcat_t: (length, 2*L_pad) = [Wv^T | Wu^T]  (or (length, L_pad) = Wu^T if
              not gate), each half zero-padded to L_pad = round_up(L, 128) so
              the in-kernel gate split is lane-aligned. Optionally cast to
              `dtype` (e.g. bf16) for a halved HBM stream.
      w1_row: (1, L_pad) f32, zero-padded (padded lanes contribute 0 logits).
    """
    L, length = wv.shape
    l_pad = _round_up(L, 128)
    pad = ((0, 0), (0, l_pad - L))
    w1_row = jnp.pad(w1.astype(jnp.float32), pad)
    if gate:
        wcat_t = jnp.concatenate(
            [jnp.pad(wv.T, pad), jnp.pad(wu.T, pad)], axis=1)   # (length, 2*L_pad)
    else:
        wcat_t = jnp.pad(wu.T, pad)                              # (length, L_pad)
    if dtype is not None:
        wcat_t = wcat_t.astype(dtype)
    return wcat_t, w1_row


def _make_kernel(n_valid, tile_n, gate, l_pad, needs_mask):
    def kernel(x_ref, wcat_hbm, w1_ref, o_ref,
               m_ref, l_ref, acc_ref, w_vmem, w_sem):
        # x_ref   : (tile_n, length)  streaming dtype (f32 or bf16)
        # wcat_hbm: (length, wcols)   raw HBM ref (memory_space=pl.ANY)
        # w1_ref  : (1, l_pad) f32
        # o_ref   : (1, length)
        # scratch : m/l (1,1) f32, acc (1,length) f32, w_vmem resident weights,
        #           w_sem DMA semaphore for the one-time weight copy.
        i = pl.program_id(0)

        @pl.when(i == 0)
        def _init():
            # Weights are grid-invariant: DMA once into a single VMEM copy
            # (half the footprint of a double-buffered BlockSpec input).
            cp = pltpu.make_async_copy(wcat_hbm, w_vmem, w_sem)
            cp.start()
            m_ref[...] = jnp.full_like(m_ref, -1e30)
            l_ref[...] = jnp.zeros_like(l_ref)
            acc_ref[...] = jnp.zeros_like(acc_ref)
            cp.wait()

        x = x_ref[...]                                            # (T, length)

        if needs_mask:
            # Ragged last tile: rows >= n_valid are out-of-bounds reads and may
            # hold garbage / NaN bits. Zero them (protects the matmul and p*x)
            # and force their logits to -1e30 (zero softmax weight).
            row = i * tile_n + jax.lax.broadcasted_iota(
                jnp.int32, (tile_n, 1), 0)
            valid = row < n_valid                                 # (T, 1) bool
            x = jnp.where(valid, x, jnp.zeros((), x.dtype))

        # Fused score matmul: one MXU pass over [Wv^T | Wu^T], f32 accumulation.
        vu = jnp.dot(x, w_vmem[...], preferred_element_type=jnp.float32)
        if gate:
            # Lane-aligned split (l_pad is a multiple of 128): both halves are
            # free tile-aligned views, no cross-lane shuffles.
            y = jax.nn.sigmoid(vu[:, :l_pad]) * jnp.tanh(vu[:, l_pad:])
        else:
            y = jnp.tanh(vu)                                      # (T, l_pad)

        # Attention logits via VPU multiply + lane reduce (no 1-col MXU matmul).
        a = jnp.sum(y * w1_ref[...], axis=-1, keepdims=True)      # (T, 1) f32
        if needs_mask:
            a = jnp.where(valid, a, jnp.float32(-1e30))

        # Online softmax update; state stays f32 regardless of streaming dtype.
        m_prev = m_ref[...]                                       # (1, 1)
        m_new = jnp.maximum(m_prev, jnp.max(a, axis=0, keepdims=True))
        alpha = jnp.exp(m_prev - m_new)                           # (1, 1)
        p = jnp.exp(a - m_new)                                    # (T, 1)
        l_ref[...] = alpha * l_ref[...] + jnp.sum(p, axis=0, keepdims=True)
        # Weighted pooling: broadcast-mul + sublane reduce (no transpose, no MXU).
        acc_ref[...] = alpha * acc_ref[...] + jnp.sum(
            p * x.astype(jnp.float32), axis=0, keepdims=True)
        m_ref[...] = m_new

        @pl.when(i == pl.num_programs(0) - 1)
        def _finalize():
            o_ref[...] = (acc_ref[...] / l_ref[...]).astype(o_ref.dtype)

    return kernel


def _choose_tile_n(n, length, x_itemsize, w_bytes):
    """Pick the largest x tile (rows) that fits the generation-aware VMEM budget."""
    cap = _vmem_capacity_bytes()
    # Reserve VMEM for the resident weight copy, accumulator / output / w1
    # buffers and compiler-internal scratch; the double-buffered x stream gets
    # the rest of ~70% of physical capacity.
    reserve = w_bytes + (8 << 20)
    budget = max(2 << 20, int(cap * 0.7) - reserve)
    per_row = max(1, length * x_itemsize)
    max_rows = max(8, min(budget // (2 * per_row), 8192))   # x is double-buffered
    if n <= max_rows:
        return n                      # single block (block dim == array dim is legal)
    return max(8, (int(max_rows) // 8) * 8)


@functools.partial(jax.jit, static_argnames=("gate", "tile_n"))
def attention_forward(x, wcat_t, w1, gate=True, tile_n=None):
    """x: (1, N, length) (f32 or bf16); wcat_t/w1 from prepare_weights().

    Returns the pooled bag representation of shape (1, length) in x.dtype.
    """
    x2d = x[0]                                   # matches torch `x = x[0]`
    N, length = x2d.shape
    l_pad = w1.shape[1]
    wcols = wcat_t.shape[1]
    assert wcat_t.shape[0] == length, "wcat_t must be (length, wcols)"
    assert wcols == (2 * l_pad if gate else l_pad), "wcat_t / w1 / gate mismatch"

    if N == 0:
        # Empty bag: softmax over an empty axis -> zero pooled output.
        return jnp.zeros((1, length), x2d.dtype)

    x_item = jnp.dtype(x2d.dtype).itemsize
    w_item = jnp.dtype(wcat_t.dtype).itemsize
    w_bytes = length * wcols * w_item

    if tile_n is None:
        tile_n = _choose_tile_n(N, length, x_item, w_bytes)
    else:
        tile_n = int(tile_n)
        tile_n = N if tile_n >= N else max(8, (tile_n // 8) * 8)

    grid_n = pl.cdiv(N, tile_n)
    needs_mask = (N % tile_n) != 0               # only the last tile is ragged

    kernel = _make_kernel(N, tile_n, gate, l_pad, needs_mask)

    # Generation-aware VMEM limit: double-buffered x + resident weights +
    # accumulators + margin, capped at the chip's physical VMEM.
    required = (2 * tile_n * length * x_item      # x tiles (double-buffered)
                + w_bytes                         # single resident weight copy
                + 2 * l_pad * 4                   # w1 buffers
                + 2 * length * x_item             # output buffers
                + (length + 2) * 4)               # acc + m + l scratch
    vmem_limit = int(min(_vmem_capacity_bytes(),
                         max(32 << 20, required + (8 << 20))))

    flops = int(2 * N * length * wcols + 6 * N * l_pad + 4 * N * length)
    transcendentals = int(N * (wcols + 1))
    bytes_accessed = int(N * length * x_item + w_bytes + l_pad * 4
                         + length * x_item)

    out = pl.pallas_call(
        kernel,
        out_shape=jax.ShapeDtypeStruct((1, length), x2d.dtype),
        grid_spec=pltpu.PrefetchScalarGridSpec(
            num_scalar_prefetch=0,
            grid=(grid_n,),
            in_specs=[
                pl.BlockSpec((tile_n, length), lambda i: (i, 0)),  # streamed x
                pl.BlockSpec(memory_space=pl.ANY),                 # weights (manual DMA once)
                pl.BlockSpec((1, l_pad), lambda i: (0, 0)),        # w1 row
            ],
            out_specs=pl.BlockSpec((1, length), lambda i: (0, 0)),
            scratch_shapes=[
                pltpu.VMEM((1, 1), jnp.float32),             # running max m
                pltpu.VMEM((1, 1), jnp.float32),             # running sum l
                pltpu.VMEM((1, length), jnp.float32),        # pooled accumulator
                pltpu.VMEM((length, wcols), wcat_t.dtype),   # resident weight copy
                pltpu.SemaphoreType.DMA(()),                 # weight-copy semaphore
            ],
        ),
        compiler_params=pltpu.CompilerParams(
            dimension_semantics=("arbitrary",),
            vmem_limit_bytes=vmem_limit),
        cost_estimate=pl.CostEstimate(
            flops=flops,
            transcendentals=transcendentals,
            bytes_accessed=bytes_accessed),
    )(x2d, wcat_t, w1)

    return out


def _reference(x, wv, wu, w1, gate=True):
    x2d = x[0].astype(jnp.float32)
    if gate:
        y = jax.nn.sigmoid(x2d @ wv.T) * jnp.tanh(x2d @ wu.T)
    else:
        y = jnp.tanh(x2d @ wu.T)
    a = jax.nn.softmax(y @ w1.T, axis=0)         # (N, 1), softmax over instances
    return a.T @ x2d                             # (1, length)


if __name__ == "__main__":
    # Shapes implied by the module: x = (1, N, length); linearV/U: length -> L.
    # N=40 with tile_n=16 exercises multi-tile online softmax + the in-kernel
    # ragged-edge masking (tiles of 16, 16, 8-valid rows).
    N, length, L = 40, 32, 16

    key = jax.random.PRNGKey(0)
    kx, kv, ku, k1 = jax.random.split(key, 4)

    x = jax.random.normal(kx, (1, N, length), dtype=jnp.float32)
    blen = 1.0 / (length ** 0.5)
    bl = 1.0 / (L ** 0.5)
    wv = jax.random.uniform(kv, (L, length), jnp.float32, -blen, blen)
    wu = jax.random.uniform(ku, (L, length), jnp.float32, -blen, blen)
    w1 = jax.random.uniform(k1, (1, L), jnp.float32, -bl, bl)

    # --- f32 gated path, multi-tile with ragged last tile. -------------------
    wcat_g, w1_row = prepare_weights(wv, wu, w1, gate=True)   # one-time weight prep
    out = attention_forward(x, wcat_g, w1_row, gate=True, tile_n=16)
    out = jax.block_until_ready(out)
    ref = _reference(x, wv, wu, w1, gate=True)
    assert out.shape == (1, length), out.shape
    assert jnp.allclose(out, ref, atol=1e-4, rtol=1e-4), (out, ref)

    # --- f32 ungated path (tanh-only scores), auto tile (single block). ------
    wcat_u, _ = prepare_weights(wv, wu, w1, gate=False)
    out_u = attention_forward(x, wcat_u, w1_row, gate=False)
    out_u = jax.block_until_ready(out_u)
    ref_u = _reference(x, wv, wu, w1, gate=False)
    assert jnp.allclose(out_u, ref_u, atol=1e-4, rtol=1e-4), (out_u, ref_u)

    # --- bf16 streaming path: halves the dominant HBM stream; softmax state,
    #     accumulation and logits stay f32 in-kernel. -------------------------
    x16 = x.astype(jnp.bfloat16)
    wcat16, _ = prepare_weights(wv, wu, w1, gate=True, dtype=jnp.bfloat16)
    out16 = attention_forward(x16, wcat16, w1_row, gate=True, tile_n=16)
    out16 = jax.block_until_ready(out16)
    assert out16.shape == (1, length), out16.shape
    assert jnp.allclose(out16.astype(jnp.float32), ref, atol=5e-2, rtol=5e-2), (
        out16, ref)

    print("KERNEL_OK")
</pallas_src>

<mosaic_0001>
module attributes {stable_mosaic.version = 11 : i64} {
  func.func @kernel(%arg0: i32, %arg1: memref<16x32xf32, #tpu.memory_space<vmem>>, %arg2: memref<32x256xf32, #tpu.memory_space<any>>, %arg3: memref<1x128xf32, #tpu.memory_space<vmem>>, %arg4: memref<1x32xf32, #tpu.memory_space<vmem>>, %arg5: memref<1x1xf32, #tpu.memory_space<vmem>>, %arg6: memref<1x1xf32, #tpu.memory_space<vmem>>, %arg7: memref<1x32xf32, #tpu.memory_space<vmem>>, %arg8: memref<32x256xf32, #tpu.memory_space<vmem>>, %arg9: memref<!tpu.dma_semaphore, #tpu.memory_space<semaphore_mem>>) attributes {dimension_semantics = [#tpu.dimension_semantics<arbitrary>], iteration_bounds = array<i64: 3>, scalar_prefetch = 0 : i64, scratch_operands = 5 : i64, tpu.core_type = #tpu.core_type<tc>, window_params = [{transform_indices = @transform_0, window_bounds = array<i64: 16, 32>}, {}, {pipeline_mode = #tpu.pipeline_mode<synchronous>, transform_indices = @transform_2, window_bounds = array<i64: 1, 128>}, {pipeline_mode = #tpu.pipeline_mode<synchronous>, transform_indices = @transform_3, window_bounds = array<i64: 1, 32>}]} {
    %c0_i32 = arith.constant 0 : i32
    %0 = arith.cmpi eq, %arg0, %c0_i32 : i32
    %1 = arith.extui %0 : i1 to i32
    %c0_i32_0 = arith.constant 0 : i32
    %2 = arith.cmpi ne, %1, %c0_i32_0 : i32
    scf.if %2 {
      tpu.enqueue_dma source(%arg2 : memref<32x256xf32, #tpu.memory_space<any>>) target(%arg8 : memref<32x256xf32, #tpu.memory_space<vmem>>) target_semaphore(%arg9 : memref<!tpu.dma_semaphore, #tpu.memory_space<semaphore_mem>>)
      %cst_26 = arith.constant -1.000000e+30 : f32
      %60 = vector.broadcast %cst_26 : f32 to vector<1x1xf32>
      %c0_27 = arith.constant 0 : index
      %c0_28 = arith.constant 0 : index
      %61 = vector.load %arg5[%c0_27, %c0_28] : memref<1x1xf32, #tpu.memory_space<vmem>>, vector<1x1xf32>
      tpu.vector_store %arg5[%c0_27, %c0_28], %60 {strides = array<i32>} : memref<1x1xf32, #tpu.memory_space<vmem>>, vector<1x1xf32>,
      %cst_29 = arith.constant 0.000000e+00 : f32
      %62 = vector.broadcast %cst_29 : f32 to vector<1x1xf32>
      %c0_30 = arith.constant 0 : index
      %c0_31 = arith.constant 0 : index
      %63 = vector.load %arg6[%c0_30, %c0_31] : memref<1x1xf32, #tpu.memory_space<vmem>>, vector<1x1xf32>
      tpu.vector_store %arg6[%c0_30, %c0_31], %62 {strides = array<i32>} : memref<1x1xf32, #tpu.memory_space<vmem>>, vector<1x1xf32>,
      %cst_32 = arith.constant 0.000000e+00 : f32
      %64 = vector.broadcast %cst_32 : f32 to vector<1x32xf32>
      %c0_33 = arith.constant 0 : index
      %c0_34 = arith.constant 0 : index
      %65 = vector.load %arg7[%c0_33, %c0_34] : memref<1x32xf32, #tpu.memory_space<vmem>>, vector<1x32xf32>
      tpu.vector_store %arg7[%c0_33, %c0_34], %64 {strides = array<i32>} : memref<1x32xf32, #tpu.memory_space<vmem>>, vector<1x32xf32>,
      tpu.wait_dma2 semaphore(%arg9 : memref<!tpu.dma_semaphore, #tpu.memory_space<semaphore_mem>>) src(%arg2 : memref<32x256xf32, #tpu.memory_space<any>>) dst(%arg8 : memref<32x256xf32, #tpu.memory_space<vmem>>)
    } else {
    }
    %c0 = arith.constant 0 : index
    %c0_1 = arith.constant 0 : index
    %3 = vector.load %arg1[%c0, %c0_1] : memref<16x32xf32, #tpu.memory_space<vmem>>, vector<16x32xf32>
    %c16_i32 = arith.constant 16 : i32
    %4 = arith.muli %arg0, %c16_i32 : i32
    %5 = tpu.iota {dimensions = array<i32: 0>} : vector<16x1xi32>
    %6 = vector.broadcast %4 : i32 to vector<16x1xi32>
    %7 = arith.addi %6, %5 : vector<16x1xi32>
    %c40_i32 = arith.constant 40 : i32
    %8 = vector.broadcast %c40_i32 : i32 to vector<16x1xi32>
    %9 = arith.cmpi slt, %7, %8 : vector<16x1xi32>
    %cst = arith.constant 0.000000e+00 : f32
    %10 = vector.shape_cast %9 : vector<16x1xi1> to vector<16x1xi1>
    %11 = vector.broadcast %10 : vector<16x1xi1> to vector<16x32xi1>
    %12 = vector.broadcast %cst : f32 to vector<16x32xf32>
    %13 = arith.select %11, %3, %12 : vector<16x32xi1>, vector<16x32xf32>
    %c0_2 = arith.constant 0 : index
    %c0_3 = arith.constant 0 : index
    %14 = vector.load %arg8[%c0_2, %c0_3] : memref<32x256xf32, #tpu.memory_space<vmem>>, vector<32x256xf32>
    %cst_4 = arith.constant dense<0.000000e+00> : vector<16x256xf32>
    %15 = tpu.matmul %13, %14, %cst_4 {dimension_numbers = #tpu.dot_dimension_numbers<[1], [0], [0], [1], [0, 0, 1, 1], [], []>} : vector<16x32xf32>, vector<32x256xf32>, vector<16x256xf32> -> vector<16x256xf32>
    %16 = vector.extract_strided_slice %15 {offsets = [0, 0], sizes = [16, 128], strides = [1, 1]} : vector<16x256xf32> to vector<16x128xf32>
    %17 = arith.negf %16 : vector<16x128xf32>
    %18 = math.exp %17 : vector<16x128xf32>
    %cst_5 = arith.constant 1.000000e+00 : f32
    %19 = vector.broadcast %cst_5 : f32 to vector<16x128xf32>
    %20 = arith.addf %19, %18 : vector<16x128xf32>
    %21 = arith.divf %19, %20 : vector<16x128xf32>
    %22 = vector.extract_strided_slice %15 {offsets = [0, 128], sizes = [16, 128], strides = [1, 1]} : vector<16x256xf32> to vector<16x128xf32>
    %23 = math.tanh %22 : vector<16x128xf32>
    %24 = arith.mulf %21, %23 : vector<16x128xf32>
    %c0_6 = arith.constant 0 : index
    %c0_7 = arith.constant 0 : index
    %25 = vector.load %arg3[%c0_6, %c0_7] : memref<1x128xf32, #tpu.memory_space<vmem>>, vector<1x128xf32>
    %26 = vector.broadcast %25 : vector<1x128xf32> to vector<16x128xf32>
    %27 = arith.mulf %24, %26 : vector<16x128xf32>
    %cst_8 = arith.constant dense<0.000000e+00> : vector<16xf32>
    %28 = vector.multi_reduction <add>, %27, %cst_8 [1] : vector<16x128xf32> to vector<16xf32>
    %29 = vector.shape_cast %28 : vector<16xf32> to vector<16x1xf32>
    %cst_9 = arith.constant -1.000000e+30 : f32
    %30 = vector.broadcast %cst_9 : f32 to vector<16x1xf32>
    %31 = arith.select %9, %29, %30 : vector<16x1xi1>, vector<16x1xf32>
    %c0_10 = arith.constant 0 : index
    %c0_11 = arith.constant 0 : index
    %32 = vector.load %arg5[%c0_10, %c0_11] : memref<1x1xf32, #tpu.memory_space<vmem>>, vector<1x1xf32>
    %cst_12 = arith.constant dense<0xFF800000> : vector<1xf32>
    %33 = vector.multi_reduction <maximumf>, %31, %cst_12 [0] : vector<16x1xf32> to vector<1xf32>
    %34 = vector.shape_cast %33 : vector<1xf32> to vector<1x1xf32>
    %35 = arith.maximumf %32, %34 : vector<1x1xf32>
    %36 = arith.subf %32, %35 : vector<1x1xf32>
    %37 = math.exp %36 : vector<1x1xf32>
    %38 = vector.broadcast %35 : vector<1x1xf32> to vector<16x1xf32>
    %39 = arith.subf %31, %38 : vector<16x1xf32>
    %40 = math.exp %39 : vector<16x1xf32>
    %c0_13 = arith.constant 0 : index
    %c0_14 = arith.constant 0 : index
    %41 = vector.load %arg6[%c0_13, %c0_14] : memref<1x1xf32, #tpu.memory_space<vmem>>, vector<1x1xf32>
    %42 = arith.mulf %37, %41 : vector<1x1xf32>
    %cst_15 = arith.constant dense<0.000000e+00> : vector<1xf32>
    %43 = vector.multi_reduction <add>, %40, %cst_15 [0] : vector<16x1xf32> to vector<1xf32>
    %44 = vector.shape_cast %43 : vector<1xf32> to vector<1x1xf32>
    %45 = arith.addf %42, %44 : vector<1x1xf32>
    %c0_16 = arith.constant 0 : index
    %c0_17 = arith.constant 0 : index
    %46 = vector.load %arg6[%c0_16, %c0_17] : memref<1x1xf32, #tpu.memory_space<vmem>>, vector<1x1xf32>
    tpu.vector_store %arg6[%c0_16, %c0_17], %45 {strides = array<i32>} : memref<1x1xf32, #tpu.memory_space<vmem>>, vector<1x1xf32>,
    %c0_18 = arith.constant 0 : index
    %c0_19 = arith.constant 0 : index
    %47 = vector.load %arg7[%c0_18, %c0_19] : memref<1x32xf32, #tpu.memory_space<vmem>>, vector<1x32xf32>
    %48 = vector.broadcast %37 : vector<1x1xf32> to vector<1x32xf32>
    %49 = arith.mulf %48, %47 : vector<1x32xf32>
    %50 = vector.broadcast %40 : vector<16x1xf32> to vector<16x32xf32>
    %51 = arith.mulf %50, %13 : vector<16x32xf32>
    %cst_20 = arith.constant dense<0.000000e+00> : vector<32xf32>
    %52 = vector.multi_reduction <add>, %51, %cst_20 [0] : vector<16x32xf32> to vector<32xf32>
    %53 = vector.shape_cast %52 : vector<32xf32> to vector<1x32xf32>
    %54 = arith.addf %49, %53 : vector<1x32xf32>
    %c0_21 = arith.constant 0 : index
    %c0_22 = arith.constant 0 : index
    %55 = vector.load %arg7[%c0_21, %c0_22] : memref<1x32xf32, #tpu.memory_space<vmem>>, vector<1x32xf32>
    tpu.vector_store %arg7[%c0_21, %c0_22], %54 {strides = array<i32>} : memref<1x32xf32, #tpu.memory_space<vmem>>, vector<1x32xf32>,
    %c0_23 = arith.constant 0 : index
    %c0_24 = arith.constant 0 : index
    %56 = vector.load %arg5[%c0_23, %c0_24] : memref<1x1xf32, #tpu.memory_space<vmem>>, vector<1x1xf32>
    tpu.vector_store %arg5[%c0_23, %c0_24], %35 {strides = array<i32>} : memref<1x1xf32, #tpu.memory_space<vmem>>, vector<1x1xf32>,
    %c2_i32 = arith.constant 2 : i32
    %57 = arith.cmpi eq, %arg0, %c2_i32 : i32
    %58 = arith.extui %57 : i1 to i32
    %c0_i32_25 = arith.constant 0 : i32
    %59 = arith.cmpi ne, %58, %c0_i32_25 : i32
    scf.if %59 {
      %c0_26 = arith.constant 0 : index
      %c0_27 = arith.constant 0 : index
      %60 = vector.load %arg7[%c0_26, %c0_27] : memref<1x32xf32, #tpu.memory_space<vmem>>, vector<1x32xf32>
      %c0_28 = arith.constant 0 : index
      %c0_29 = arith.constant 0 : index
      %61 = vector.load %arg6[%c0_28, %c0_29] : memref<1x1xf32, #tpu.memory_space<vmem>>, vector<1x1xf32>
      %62 = vector.broadcast %61 : vector<1x1xf32> to vector<1x32xf32>
      %63 = arith.divf %60, %62 : vector<1x32xf32>
      %c0_30 = arith.constant 0 : index
      %c0_31 = arith.constant 0 : index
      %64 = vector.load %arg4[%c0_30, %c0_31] : memref<1x32xf32, #tpu.memory_space<vmem>>, vector<1x32xf32>
      tpu.vector_store %arg4[%c0_30, %c0_31], %63 {strides = array<i32>} : memref<1x32xf32, #tpu.memory_space<vmem>>, vector<1x32xf32>,
    } else {
    }
    return
  }
  func.func @transform_0(%arg0: i32) -> (i32, i32) {
    %c0_i32 = arith.constant 0 : i32
    %c0_i32_0 = arith.constant 0 : i32
    return %arg0, %c0_i32 : i32, i32
  }
  func.func @transform_2(%arg0: i32) -> (i32, i32) {
    %c0_i32 = arith.constant 0 : i32
    %c0_i32_0 = arith.constant 0 : i32
    %c0_i32_1 = arith.constant 0 : i32
    return %c0_i32, %c0_i32_0 : i32, i32
  }
  func.func @transform_3(%arg0: i32) -> (i32, i32) {
    %c0_i32 = arith.constant 0 : i32
    %c0_i32_0 = arith.constant 0 : i32
    %c0_i32_1 = arith.constant 0 : i32
    return %c0_i32, %c0_i32_0 : i32, i32
  }
}

</mosaic_0001>

<bundles_post_ra>
// kernel: attention_forward.1
= control target key start
LH: loop header
LB: loop body
LE: loop exit
PB: predicated region body
PF: predicated region fallthrough
CT: control target
= control target key end

     0   :  { %8 = vsyncpa [#allocation8], 0  ;;  %s650_s12 = smov 0   ;;  %s741_s0 = inlined_call_operand.vmem [shape: f32[40,32], index: 0, kind: input, shape index: {}]   ;;  %s742_s1 = inlined_call_operand.vmem [shape: f32[32,256], index: 1, kind: input, shape index: {}]   ;;  %s743_s2 = inlined_call_operand.vmem [shape: f32[1,128], index: 2, kind: input, shape index: {}]   ;;  %s744_s3 = inlined_call_operand.hbm [shape: f32[1,32], index: 3, kind: output, shape index: {}]  }
   0x1 LB: > { %s656_s13 = sadd.s32 4294967295, %s622_s12   ;;  %p519_p0 = scmp.ge.s32.totalorder %s622_s12, 1  ;;  %s622_s12 = sphi %s650_s12, %s14_s12  }
   0x2   : > { %p118_p1 = scmp.lt.s32.totalorder %s622_s12, 4 }
   0x4   : > { %p119_p2 = pnand %p519_p0, %p118_p1 }
   0x5   : > { %s520_s14 = sshll.u32 (!%p119_p2), %s656_s13, 1  ;;  %p522_p4 = scmp.ne.s32.totalorder (!%p119_p2), %s656_s13, 0 }
   0x6   : > { %122 = sbr.rel (%p119_p2) target bundleno = 752 (0x2f0), region = 28  ;;  %p144_p3 = scmp.lt.s32.totalorder (!%p119_p2), %s520_s14, 4 }
   0xb   : > { %s746_s14 = smov (!%p144_p3, %s520_s14), 4  ;;  %156 = sbr.rel (%p522_p4) target bundleno = 26 (0x1a), region = 32 }
   0xc   : > { %s521_s15 = sshll.u32 %s746_s14, 3 }
   0xd   : > { %s664_s18 = scalar_lea.vmem %s741_s0, %s521_s15 }
  0x10   : > { %v190_v0 = vld [vmem:[%s742_s1] sm:$0xff]  ;;  %v192_v1 = vld [vmem:[%s742_s1 + $0x8] sm:$0xff]  ;;  %v194_v2 = vld [vmem:[%s742_s1 + $0x10] sm:$0xff] }
  0x11   : > { %191 = vst [vmem:[#allocation5 + $0x30] sm:$0xff] %v190_v0  ;;  %193 = vst [vmem:[#allocation5] sm:$0xff] %v192_v1  ;;  %v196_v3 = vld [vmem:[%s742_s1 + $0x18] sm:$0xff]  ;;  %v198_v4 = vld [vmem:[%s742_s1 + $0x20] sm:$0xff] }
  0x12   : > { %195 = vst [vmem:[#allocation5 + $0x18] sm:$0xff] %v194_v2  ;;  %v200_v5 = vld [vmem:[%s742_s1 + $0x28] sm:$0xff]  ;;  %197 = vst [vmem:[#allocation5 + $0x10] sm:$0xff] %v196_v3  ;;  %v202_v6 = vld [vmem:[%s742_s1 + $0x30] sm:$0xff] }
  0x13   : > { %199 = vst [vmem:[#allocation5 + $0x8] sm:$0xff] %v198_v4  ;;  %201 = vst [vmem:[#allocation5 + $0x20] sm:$0xff] %v200_v5  ;;  %v204_v7 = vld [vmem:[%s742_s1 + $0x38] sm:$0xff] }
  0x14   : > { %203 = vst [vmem:[#allocation5 + $0x28] sm:$0xff] %v202_v6  ;;  %205 = vst [vmem:[#allocation5 + $0x38] sm:$0xff] %v204_v7 }
  0x15   : > { %213 = vsyncadd [#allocation6], 1024  ;;  %vm214_vm0 = vcmask 0   ;;  %v624_v8 = vmov -1e+30   ;;  %v625_v9 = vmov 0.0  }
  0x16   : > { %215 = vst.msk [vmem:[#allocation2] sm:$0x1] %vm214_vm0, %v624_v8  ;;  %216 = vst.msk [vmem:[#allocation3] sm:$0x1] %vm214_vm0, %v625_v9  ;;  %vm217_vm1 = vcmask 253952  }
  0x17   : > { %218 = vst.msk [vmem:[#allocation4] sm:$0x1] %vm217_vm1, %v625_v9 }
  0x18   : > { %614 = dma.done.wait [#allocation6], 1024 }
  0x19   : > { %615 = vsyncadd [#allocation6], 4294966272 }
  0x1a PF: > { %v245_v12 = vld [vmem:[#allocation5 + $0x20] sm:$0xff]  ;;  %s523_s8 = sshll.u32 %s656_s13, 4  ;;  %v226_v13 = vlaneseq  ;;  %v244_v14 = vld [vmem:[#allocation5 + $0x8] sm:$0xff]  ;;  %v243_v16 = vld [vmem:[#allocation5 + $0x10] sm:$0xff]  ;;  %vm248_vm3 = vcmask 261120   ;;  %v626_v27 = vmov 0.0  }
  0x1b   : > { %v247_v10 = vld [vmem:[#allocation5 + $0x38] sm:$0xff]  ;;  %v246_v11 = vld [vmem:[#allocation5 + $0x28] sm:$0xff]  ;;  %v229_v15 = vstv %s523_s8  ;;  %v241_v19 = vld [vmem:[#allocation5] sm:$0xff]  ;;  %319 = vmatprep.mubr.f32.mxu0 %v626_v27  ;;  %325 = vmatprep.mubr.f32.mxu1 %v626_v27  ;;  %v627_v48 = vmov 0   ;;  %vm400_vm5 = vcmask 0   ;;  %vm389_vm6 = vcmask 7168  }
  0x1c   : > { %279 = vmatprep.subr.mxu0 %v247_v10  ;;  %535 = vmatprep.subr.mxu1 %v247_v10  ;;  %v692_v17 = vshrl.u32 %v226_v13, 7  ;;  %v242_v18 = vld [vmem:[#allocation5 + $0x18] sm:$0xff]  ;;  %v240_v23 = vld [vmem:[#allocation5 + $0x30] sm:$0xff]  ;;  %v224_v24 = vld [vmem:[%s664_s18 + $0x8] sm:$0xff]  ;;  %vm435_vm7 = vcmask 253952   ;;  %p529_p5 = scmp.ne.s32.totalorder %s656_s13, 2 }
  0x1d   : > { %280 = vmatpush1.msra.mxu0 %v246_v11  ;;  %539 = vmatpush1.msra.mxu1 %v246_v11  ;;  %v223_v20 = vld [vmem:[%s664_s18] sm:$0xff] }
  0x1e   : > { %281 = vmatprep.subr.mxu0 %v245_v12  ;;  %536 = vmatprep.subr.mxu1 %v245_v12  ;;  %v230_v21 = vadd.s32 %v229_v15, %v692_v17  ;;  %v228_v22 = vadd.s32 8, %v692_v17  ;;  %v528_v41 = vld [vmem:[%s743_s2] ss:$0 sm:$0xff]  ;;  %v714_v60 = vsub.s32 0, %v692_v17 }
  0x1f   : > { %282 = vmatpush1.msra.mxu0 %v244_v14  ;;  %540 = vmatpush1.msra.mxu1 %v244_v14  ;;  %v363_v59 = vld [vmem:[#allocation2] sm:$0x1] }
  0x20   : > { %283 = vmatprep.subr.mxu0 %v243_v16  ;;  %537 = vmatprep.subr.mxu1 %v243_v16  ;;  %vm232_vm2 = vcmp.lt.s32.totalorder %v230_v21, 40  ;;  %v231_v25 = vadd.s32 %v229_v15, %v228_v22  ;;  %v387_v16 = vld [vmem:[#allocation3] sm:$0x1] }
  0x21   : > { %284 = vmatpush1.msra.mxu0 %v242_v18  ;;  %541 = vmatpush1.msra.mxu1 %v242_v18  ;;  %v699_v26 = vsel %vm232_vm2, %v223_v20, 0.0 }
  0x22   : > { %285 = vmatprep.subr.mxu0 %v241_v19  ;;  %538 = vmatprep.subr.mxu1 %v241_v19  ;;  %vm233_vm4 = vcmp.lt.s32.totalorder %v231_v25, 40 }
  0x23   : > { %286 = vmatpush1.msra.mxu0 %v240_v23  ;;  %542 = vmatpush1.msra.mxu1 %v240_v23  ;;  %v704_v28 = vsel %vm233_vm4, %v224_v24, 0.0 }
  0x24   : > { %524 = vmatmul.mubr.msk.f32.vlgmr.msra.gmra.mxu0 %vm248_vm3, %v699_v26  ;;  %525 = vmatmul.mubr.msk.f32.vlgmr.msra.gmra.mxu1 %vm248_vm3, %v704_v28 }
  0x25   : > { %564 = vset.pattern.permute.xlu0 %v627_v48  ;;  %563 = vset.pattern.permute.xlu1 %v627_v48 }
  0xe4   : > { %v321_v29 = vpop.f32.mrf.mxu0  ;;  %v327_v31 = vpop.f32.mrf.mxu1 }
  0xe5   : > { %v526_v30 = vmul.f32 -1.442695, %v321_v29  ;;  %v527_v32 = vmul.f32 -1.442695, %v327_v31 }
  0xe6   : > { %v323_v33 = vpop.f32.mrf.mxu0  ;;  %v329_v36 = vpop.f32.mrf.mxu1 }
  0xe7   : > { %565 = vpow2.f32 %v526_v30 }
  0xe8   : > { %567 = vpow2.f32 %v527_v32 }
  0xe9   : > { %569 = vtanh.f32 %v323_v33 }
  0xf4   : > { %v566_v34 = vpop.eup %565 }
  0xf5   : > { %v338_v35 = vadd.f32 1.0, %v566_v34  ;;  %v568_v37 = vpop.eup %567 }
  0xf6   : > { %v339_v38 = vadd.f32 1.0, %v568_v37  ;;  %v570_v39 = vpop.eup %569 }
  0xf7   : > { %571 = vrcp.f32 %v338_v35 }
  0xf8   : > { %573 = vtanh.f32 %v329_v36  ;;  %v402_v36 = vld [vmem:[#allocation4] sm:$0x1] }
  0xf9   : > { %575 = vrcp.f32 %v339_v38 }
 0x104   : > { %v572_v40 = vpop.eup %571 }
 0x105   : > { %v574_v42 = vpop.eup %573  ;;  %v346_v43 = vmul.f32 %v572_v40, %v570_v39 }
 0x106   : > { %v576_v44 = vpop.eup %575 }
 0x107   : > { %v355_v45 = vmul.f32 %v528_v41, %v346_v43  ;;  %v347_v46 = vmul.f32 %v576_v44, %v574_v42 }
 0x109   : > { %357 = vadd.xlane.f32.xlu0 %v355_v45  ;;  %v356_v47 = vmul.f32 %v528_v41, %v347_v46 }
 0x10d   : > { %359 = vadd.xlane.f32.xlu0 %v356_v47 }
 0x192   : > { %v358_v49 = vpop.xlane.xlu0 %357 }
 0x193   : > { %v361_v51 = vsel %vm232_vm2, %v358_v49, -1e+30 }
 0x196   : > { %v360_v50 = vpop.xlane.xlu0 %359 }
 0x197   : > { %v362_v52 = vsel %vm233_vm4, %v360_v50, -1e+30 }
 0x198   : > { %v364_v53 = vmax.f32 %v361_v51, %v362_v52 }
 0x19a   : > { %v365_v54 = vrot.slane %v364_v53, 4 }
 0x19c   : > { %v366_v55 = vmax.f32 %v364_v53, %v365_v54 }
 0x19e   : > { %v367_v56 = vrot.slane %v366_v55, 2 }
 0x1a0   : > { %v368_v57 = vmax.f32 %v366_v55, %v367_v56 }
 0x1a2   : > { %v369_v58 = vrot.slane %v368_v57, 1 }
 0x1a4   : > { %v370_v61 = vmax.f32 %v368_v57, %v369_v58 }
 0x1a6   : > { %v371_v62 = vmax.f32 %v363_v59, %v370_v61 }
 0x1a8   : > { %v372_v63 = vsub.f32 %v363_v59, %v371_v62  ;;  %v379_v0 = vrot.slane %v371_v62, %v714_v60  ;;  %437 = vst.msk [vmem:[#allocation2] sm:$0x1] %vm400_vm5, %v371_v62 }
 0x1aa   : > { %v373_v1 = vmul.f32 1.442695, %v372_v63  ;;  %v381_v2 = vsub.f32 %v361_v51, %v379_v0  ;;  %v382_v3 = vsub.f32 %v362_v52, %v379_v0 }
 0x1ac   : > { %577 = vpow2.f32 %v373_v1  ;;  %v383_v4 = vmul.f32 1.442695, %v381_v2  ;;  %v385_v5 = vmul.f32 1.442695, %v382_v3 }
 0x1ae   : > { %579 = vpow2.f32 %v383_v4 }
 0x1af   : > { %581 = vpow2.f32 %v385_v5 }
 0x1b9   : > { %v578_v6 = vpop.eup %577 }
 0x1ba   : > { %405 = vperm.xlu0 %564, %v578_v6   ;;  %v388_v18 = vmul.f32 %v578_v6, %v387_v16 }
 0x1bb   : > { %v580_v7 = vpop.eup %579 }
 0x1bc   : > { %v582_v8 = vpop.eup %581  ;;  %v390_v9 = vsel %vm389_vm6, %v580_v7, 0.0  ;;  %415 = vperm.xlu1 %563, %v580_v7  }
 0x1bd   : > { %v391_v10 = vsel %vm389_vm6, %v582_v8, 0.0 }
 0x1be   : > { %v392_v11 = vadd.f32 %v391_v10, %v390_v9 }
 0x1c0   : > { %v393_v12 = vrot.slane %v392_v11, 4  ;;  %420 = vperm.xlu1 %563, %v582_v8  }
 0x1c2   : > { %v394_v13 = vadd.f32 %v393_v12, %v392_v11 }
 0x1c4   : > { %v395_v14 = vrot.slane %v394_v13, 2 }
 0x1c6   : > { %v396_v15 = vadd.f32 %v395_v14, %v394_v13 }
 0x1c8   : > { %v397_v17 = vrot.slane %v396_v15, 1 }
 0x1ca   : > { %v398_v19 = vadd.f32 %v397_v17, %v396_v15 }
 0x1cc   : > { %v399_v20 = vadd.f32 %v398_v19, %v388_v18 }
 0x1ce   : > { %401 = vst.msk [vmem:[#allocation3] sm:$0x1] %vm400_vm5, %v399_v20 }
 0x235   : > { %v406_v32 = vpop.permute.xlu0 %405 }
 0x236   : > { %v411_v34 = vrot.slane %v406_v32, %v714_v60 }
 0x237   : > { %v416_v21 = vpop.permute.xlu1 %415 }
 0x238   : > { %v423_v22 = vmul.f32 %v416_v21, %v699_v26  ;;  %v412_v38 = vmul.f32 %v411_v34, %v402_v36 }
 0x23a   : > { %v425_v25 = vsel %vm248_vm3, %v423_v22, 0.0 }
 0x23b   : > { %v421_v23 = vpop.permute.xlu1 %420 }
 0x23c   : > { %v424_v24 = vmul.f32 %v421_v23, %v704_v28 }
 0x23e   : > { %v426_v27 = vsel %vm248_vm3, %v424_v24, 0.0 }
 0x23f   : > { %v427_v29 = vadd.f32 %v426_v27, %v425_v25 }
 0x241   : > { %v428_v30 = vrot.slane %v427_v29, 4 }
 0x243   : > { %v429_v31 = vadd.f32 %v428_v30, %v427_v29 }
 0x245   : > { %v430_v33 = vrot.slane %v429_v31, 2 }
 0x247   : > { %v431_v35 = vadd.f32 %v430_v33, %v429_v31 }
 0x249   : > { %v432_v37 = vrot.slane %v431_v35, 1 }
 0x24b   : > { %v433_v39 = vadd.f32 %v432_v37, %v431_v35  ;;  %441 = sbr.rel (%p529_p5) target bundleno = 737 (0x2e1), region = 70 }
 0x24d   : > { %v434_v26 = vadd.f32 %v433_v39, %v412_v38 }
 0x24f   : > { %436 = vst.msk [vmem:[#allocation4] sm:$0x1] %vm435_vm7, %v434_v26 }
 0x250   : > { %v443_v28 = vld [vmem:[#allocation3] sm:$0x1]  ;;  %v628_v40 = vmov 0  }
 0x251   : > { %583 = vset.pattern.permute.xlu0 %v628_v40 }
 0x252   : > { %446 = vperm.xlu0 %583, %v443_v28  }
 0x256   : > { %v442_v43 = vld [vmem:[#allocation4] sm:$0x1] }
 0x2cd   : > { %v447_v41 = vpop.permute.xlu0 %446 }
 0x2ce   : > { %v452_v42 = vrot.slane %v447_v41, %v714_v60 }
 0x2d0   : > { %584 = vrcp.f32 %v452_v42 }
 0x2dd   : > { %v585_v44 = vpop.eup %584 }
 0x2de   : > { %v454_v45 = vmul.f32 %v585_v44, %v442_v43 }
 0x2e0   : > { %455 = vst.msk [vmem:[#allocation7] sm:$0x1] %vm435_vm7, %v454_v45 }
 0x2e1 PF: > { %p547_p6 = scmp.eq.s32.totalorder %s656_s13, 2  ;;  %s629_s11 = smov [#allocation7]  }
 0x2e2   : > { %s463_s14 = sshll.u32 %s629_s11, 4  ;;  %s464_s14 = int_to_ptr.vmem [resolvable:$true] %s463_s14 }
 0x2e3   : > { %s586_s15 = scalar_lea.vmem %s464_s14, 16  ;;  %s592_s16 = scalar_lea.vmem %s464_s14, 32 }
 0x2e4   : > { %p587_p7 = scmp.ne.s32.totalorder %s464_s14, %s586_s15  ;;  %p593_p10 = scmp.lt.s32.totalorder %s464_s14, %s464_s14 }
 0x2e5   : > { %p594_p11 = scmp.lt.s32.totalorder %s592_s16, %s586_s15 }
 0x2e6   : > { %p588_p8 = pnand %p587_p7, %p547_p6 }
 0x2e7   : > { %p595_p12 = por %p594_p11, %p593_p10 }
 0x2e8   : > { %p589_p9 = pneg %p588_p8 }
 0x2ea   : > { %p596_p13 = pnand %p595_p12, %p589_p9 }
 0x2ec   : > { %599 = shalt.err (!%p596_p13)
}
 0x2ed   : > { %544 = dma.vmem_to_hbm [thread:$0]  (%p547_p6), %s464_s14, 16, %s744_s3, [#allocation8]  }
 0x2ee   : > { %617 = dma.done.wait (%p547_p6), [#allocation8], 16  }
 0x2ef   : > { %619 = vsyncadd (%p547_p6), [#allocation8], 4294967280 }
 0x2f0 PF: > { %s14_s12 = sadd.s32 1, %s622_s12  }
 0x2f1   : > { %p11_p0 = scmp.ge.s32.totalorder %s14_s12, 5  }
 0x2f3   :  { %13 = sbr.rel (!%p11_p0) target bundleno = 1 (0x1), region = 105 }
 0x2f8   :  { %476 = vsyncpa [#allocation8], 1 }
 0x2f9   :  { %478 = vsyncpa [#allocation8 + $0x1], 1 }
 0x2fa   :  { %479 = vsyncmov [#allocation6] }
 0x2fd   :  { %s480_s19 = vpop.sfrf %479 }
 0x2fe   :  { %p534_p1 = scmp.ne.s32.totalorder %s480_s19, 0 }
 0x300   :  { %484 = shalt.err (%p534_p1)  }

</bundles_post_ra>
